<compile_context>
chip_gen: v5e
topology: v5e:2x2
jax: 0.10.0
libtpu: 0.0.40
codegen_flags: <defaults>
</compile_context>

<pallas_src>
import math
import functools

import jax
import jax.numpy as jnp
from jax import lax
from jax.experimental import pallas as pl
from jax.experimental.pallas import tpu as pltpu


def _encoder_layer_kernel(gb_ref, x_ref, bias_ref, cos_ref, sins_ref,
                          wqkv_ref, wo_ref, bo_ref,
                          w1_ref, b1_ref, w2_ref, b2_ref,
                          o_ref, pv_ref,
                          *, num_heads, head_dim):
    eps = 1e-5
    g0 = gb_ref[0]     # gammas[0]
    beta0 = gb_ref[1]  # betas[0]
    g1 = gb_ref[2]     # gammas[1]
    beta1 = gb_ref[3]  # betas[1]

    _, S, D = x_ref.shape
    x = x_ref[0].astype(jnp.float32)        # (S, D) - one batch per grid step
    bias = bias_ref[0]                      # (S, S) additive mask bias (f32)

    # ---- LayerNorm 1 (elementwise_affine=False) + conditioning scale/shift ----
    mu = jnp.mean(x, axis=-1, keepdims=True)
    var = jnp.mean((x - mu) ** 2, axis=-1, keepdims=True)
    h = (x - mu) * lax.rsqrt(var + eps)
    h = g0 * h + beta0

    # ---- Fused QKV matmul (qkv_bias=False), bf16 operands -> f32 accumulate ----
    qkv = jnp.dot(h.astype(jnp.bfloat16), wqkv_ref[...],
                  preferred_element_type=jnp.float32)          # (S, 3D)
    q = qkv[:, :D]
    k = qkv[:, D:2 * D]
    v = qkv[:, 2 * D:]

    # ---- Rotary embedding for all heads at once ----
    # rotate_half(x)[2i] = -x[2i+1], [2i+1] = x[2i]: realized as two XLU lane rolls
    # + even/odd select; the -1 sign on even lanes is pre-folded into sins_ref.
    cos = cos_ref[...]                      # (S, D)
    sins = sins_ref[...]                    # (S, D) = sign * sin
    lane = lax.broadcasted_iota(jnp.int32, (S, D), 1)
    even = (lane & 1) == 0

    def rope(t):
        swap = jnp.where(even,
                         pltpu.roll(t, D - 1, 1),   # x[j+1] at even lanes
                         pltpu.roll(t, 1, 1))       # x[j-1] at odd lanes
        return t * cos + swap * sins

    q = rope(q).astype(jnp.bfloat16)
    k = rope(k).astype(jnp.bfloat16)
    v = v.astype(jnp.bfloat16)

    # ---- Per-head attention; p@v written to a (S,D) scratch, one dense Wo matmul ----
    for hh in range(num_heads):
        lo = hh * head_dim
        hi = lo + head_dim
        qh = q[:, lo:hi]
        kh = k[:, lo:hi]
        vh = v[:, lo:hi]
        # scores (S, S) = qh @ kh^T   (1/sqrt(head_dim) already folded into Wq)
        score = lax.dot_general(qh, kh, (((1,), (1,)), ((), ())),
                                preferred_element_type=jnp.float32) + bias
        score = score - jnp.max(score, axis=-1, keepdims=True)
        p = jnp.exp(score)
        p = p * pl.reciprocal(jnp.sum(p, axis=-1, keepdims=True), approx=True)
        pv = jnp.dot(p.astype(jnp.bfloat16), vh,
                     preferred_element_type=jnp.float32)        # (S, head_dim)
        pv_ref[:, lo:hi] = pv.astype(jnp.bfloat16)

    attn = jnp.dot(pv_ref[...], wo_ref[...],
                   preferred_element_type=jnp.float32) + bo_ref[...]

    # residual (dropout1 has p=0.0 -> identity)
    x1 = x + attn

    # ---- LayerNorm 2 + conditioning ----
    mu2 = jnp.mean(x1, axis=-1, keepdims=True)
    var2 = jnp.mean((x1 - mu2) ** 2, axis=-1, keepdims=True)
    h2 = (x1 - mu2) * lax.rsqrt(var2 + eps)
    h2 = g1 * h2 + beta1

    # ---- FFN: Linear -> GELU (exact erf, nn.GELU default) -> Linear ----
    f = jnp.dot(h2.astype(jnp.bfloat16), w1_ref[...],
                preferred_element_type=jnp.float32) + b1_ref[...]
    f = 0.5 * f * (1.0 + lax.erf(f * (1.0 / math.sqrt(2.0))))
    f = jnp.dot(f.astype(jnp.bfloat16), w2_ref[...],
                preferred_element_type=jnp.float32) + b2_ref[...]

    # residual (dropout2 has p=0.0 -> identity)
    o_ref[0] = (x1 + f).astype(o_ref.dtype)


def transformer_encoder_layer(x, mask, params, gammas=(0.0, 0.0), betas=(0.0, 0.0)):
    """x: (B, S, D) f32, mask: (B, S, S) int32 (0 = masked)."""
    B, S, D = x.shape
    num_heads = params["num_heads"]
    head_dim = D // num_heads
    H = params["w1"].shape[1]

    # Scalars for conditioning live in SMEM.
    gb = jnp.array([gammas[0], betas[0], gammas[1], betas[1]], dtype=jnp.float32)

    # Fused QKV weight (bf16); fold 1/sqrt(head_dim) into the Q columns.
    inv_sqrt_d = 1.0 / math.sqrt(head_dim)
    wqkv = jnp.concatenate(
        [params["wq"] * inv_sqrt_d, params["wk"], params["wv"]],
        axis=1).astype(jnp.bfloat16)                                      # (D, 3D)
    wo = params["wo"].astype(jnp.bfloat16)
    w1 = params["w1"].astype(jnp.bfloat16)
    w2 = params["w2"].astype(jnp.bfloat16)

    # Rotary tables tiled across heads only (lanes). The rotate_half sign
    # (-1 on even lanes) is folded into the sin table.
    sign = jnp.where(jnp.arange(head_dim) % 2 == 0, -1.0, 1.0).astype(jnp.float32)
    cos_f = jnp.tile(params["cos"], (1, num_heads))                       # (S, D)
    sin_f = jnp.tile(params["sin"] * sign[None, :], (1, num_heads))       # (S, D)

    # Additive attention bias per batch (small: (B, S, S)).
    bias = jnp.where(mask == 0, -1.0e9, 0.0).astype(jnp.float32)

    kern = functools.partial(_encoder_layer_kernel,
                             num_heads=num_heads, head_dim=head_dim)

    def rep2(shape):
        return pl.BlockSpec(shape, lambda b: (0, 0))

    return pl.pallas_call(
        kern,
        out_shape=jax.ShapeDtypeStruct((B, S, D), jnp.float32),
        grid=(B,),
        in_specs=[
            pl.BlockSpec(memory_space=pltpu.MemorySpace.SMEM),   # gammas/betas scalars
            pl.BlockSpec((1, S, D), lambda b: (b, 0, 0)),        # x
            pl.BlockSpec((1, S, S), lambda b: (b, 0, 0)),        # additive mask bias
            rep2((S, D)),                                        # rotary cos (per-head tiled)
            rep2((S, D)),                                        # rotary sin (sign folded)
            rep2((D, 3 * D)),                                    # fused Wqkv (bf16)
            rep2((D, D)), rep2((1, D)),                          # Wo (bf16), bo
            rep2((D, H)), rep2((1, H)),                          # W1 (bf16), b1
            rep2((H, D)), rep2((1, D)),                          # W2 (bf16), b2
        ],
        out_specs=pl.BlockSpec((1, S, D), lambda b: (b, 0, 0)),
        scratch_shapes=[pltpu.VMEM((S, D), jnp.bfloat16)],       # per-head p@v slab
        compiler_params=pltpu.CompilerParams(dimension_semantics=("parallel",)),
    )(gb, x, bias, cos_f, sin_f,
      wqkv, wo, params["bo"], w1, params["b1"], w2, params["b2"])


def init_params(key, dim, hidden_dim, num_heads, seq_len):
    head_dim = dim // num_heads
    assert head_dim == 32, "RotaryEmbedding(dim=32) implies head_dim == 32"
    ks = jax.random.split(key, 9)
    s = 0.05
    params = dict(
        num_heads=num_heads,
        wq=s * jax.random.normal(ks[0], (dim, dim), jnp.float32),
        wk=s * jax.random.normal(ks[1], (dim, dim), jnp.float32),
        wv=s * jax.random.normal(ks[2], (dim, dim), jnp.float32),
        wo=s * jax.random.normal(ks[3], (dim, dim), jnp.float32),
        bo=s * jax.random.normal(ks[4], (1, dim), jnp.float32),
        w1=s * jax.random.normal(ks[5], (dim, hidden_dim), jnp.float32),
        b1=s * jax.random.normal(ks[6], (1, hidden_dim), jnp.float32),
        w2=s * jax.random.normal(ks[7], (hidden_dim, dim), jnp.float32),
        b2=s * jax.random.normal(ks[8], (1, dim), jnp.float32),
    )
    # Rotary tables (rotary_embedding_torch defaults: theta=10000, interleaved pairs).
    rot_dim = head_dim
    inv_freq = 1.0 / (10000.0 ** (jnp.arange(0, rot_dim, 2, dtype=jnp.float32) / rot_dim))
    t = jnp.arange(seq_len, dtype=jnp.float32)
    freqs = jnp.einsum("i,j->ij", t, inv_freq)        # (S, rot_dim/2)
    freqs = jnp.repeat(freqs, 2, axis=-1)             # (S, rot_dim): [f0,f0,f1,f1,...]
    params["cos"] = jnp.cos(freqs)
    params["sin"] = jnp.sin(freqs)
    return params


def _reference(x, mask, params, gammas, betas):
    """Pure-JAX f32 reference mirroring the PyTorch forward, for correctness checking."""
    B, S, D = x.shape
    nh = params["num_heads"]
    hd = D // nh

    def ln(z):
        mu = z.mean(-1, keepdims=True)
        var = ((z - mu) ** 2).mean(-1, keepdims=True)
        return (z - mu) / jnp.sqrt(var + 1e-5)

    res = x
    h = gammas[0] * ln(x) + betas[0]
    q = (h @ params["wq"]).reshape(B, S, nh, hd).transpose(0, 2, 1, 3)
    k = (h @ params["wk"]).reshape(B, S, nh, hd).transpose(0, 2, 1, 3)
    v = (h @ params["wv"]).reshape(B, S, nh, hd).transpose(0, 2, 1, 3)
    cos = params["cos"][None, None]
    sin = params["sin"][None, None]

    def rope(t):
        t2 = t.reshape(*t.shape[:-1], hd // 2, 2)
        r = jnp.stack([-t2[..., 1], t2[..., 0]], axis=-1).reshape(t.shape)
        return t * cos + r * sin

    q, k = rope(q), rope(k)
    score = jnp.einsum("bhqd,bhkd->bhqk", q, k) / math.sqrt(hd)
    score = jnp.where(mask[:, None] == 0, -1.0e9, score)
    p = jax.nn.softmax(score, axis=-1)
    o = jnp.einsum("bhqk,bhkd->bhqd", p, v).transpose(0, 2, 1, 3).reshape(B, S, D)
    o = o @ params["wo"] + params["bo"][0]
    x1 = res + o
    h2 = gammas[1] * ln(x1) + betas[1]
    f = h2 @ params["w1"] + params["b1"][0]
    f = 0.5 * f * (1.0 + lax.erf(f / math.sqrt(2.0)))
    f = f @ params["w2"] + params["b2"][0]
    return x1 + f


if __name__ == "__main__":
    # dim=64, num_heads=2 -> head_dim=32, matching RotaryEmbedding(dim=32).
    B, S, D, HID, NH = 2, 8, 64, 128, 2
    key = jax.random.PRNGKey(0)
    kx, kp = jax.random.split(key)

    x = jax.random.normal(kx, (B, S, D), jnp.float32)
    # causal attention mask; positions with 0 are masked with -1e9
    mask = jnp.broadcast_to(jnp.tril(jnp.ones((S, S), jnp.int32)), (B, S, S))
    params = init_params(kp, D, HID, NH, S)

    gammas = (1.0, 0.5)
    betas = (0.2, -0.1)

    out = transformer_encoder_layer(x, mask, params, gammas, betas)
    out = jax.block_until_ready(out)

    ref = _reference(x, mask, params, gammas, betas)
    assert out.shape == (B, S, D)
    # bf16 matmul operands (deliberate, for MXU throughput) -> relaxed tolerance vs f32 ref.
    assert jnp.allclose(out, ref, atol=2e-2, rtol=2e-2), float(jnp.max(jnp.abs(out - ref)))

    print("KERNEL_OK")
</pallas_src>

<mosaic_0001>
module attributes {stable_mosaic.version = 11 : i64} {
  func.func @_encoder_layer_kernel(%arg0: i32, %arg1: memref<4xf32, #tpu.memory_space<smem>>, %arg2: memref<1x8x64xf32, #tpu.memory_space<vmem>>, %arg3: memref<1x8x8xf32, #tpu.memory_space<vmem>>, %arg4: memref<8x64xf32, #tpu.memory_space<vmem>>, %arg5: memref<8x64xf32, #tpu.memory_space<vmem>>, %arg6: memref<64x192xbf16, #tpu.memory_space<vmem>>, %arg7: memref<64x64xbf16, #tpu.memory_space<vmem>>, %arg8: memref<1x64xf32, #tpu.memory_space<vmem>>, %arg9: memref<64x128xbf16, #tpu.memory_space<vmem>>, %arg10: memref<1x128xf32, #tpu.memory_space<vmem>>, %arg11: memref<128x64xbf16, #tpu.memory_space<vmem>>, %arg12: memref<1x64xf32, #tpu.memory_space<vmem>>, %arg13: memref<1x8x64xf32, #tpu.memory_space<vmem>>, %arg14: memref<8x64xbf16, #tpu.memory_space<vmem>>) attributes {dimension_semantics = [#tpu.dimension_semantics<parallel>], iteration_bounds = array<i64: 2>, scalar_prefetch = 0 : i64, scratch_operands = 1 : i64, tpu.core_type = #tpu.core_type<tc>, window_params = [{transform_indices = @transform_0, window_bounds = array<i64: 4>}, {transform_indices = @transform_1, window_bounds = array<i64: 1, 8, 64>}, {transform_indices = @transform_2, window_bounds = array<i64: 1, 8, 8>}, {pipeline_mode = #tpu.pipeline_mode<synchronous>, transform_indices = @transform_3, window_bounds = array<i64: 8, 64>}, {pipeline_mode = #tpu.pipeline_mode<synchronous>, transform_indices = @transform_4, window_bounds = array<i64: 8, 64>}, {pipeline_mode = #tpu.pipeline_mode<synchronous>, transform_indices = @transform_5, window_bounds = array<i64: 64, 192>}, {pipeline_mode = #tpu.pipeline_mode<synchronous>, transform_indices = @transform_6, window_bounds = array<i64: 64, 64>}, {pipeline_mode = #tpu.pipeline_mode<synchronous>, transform_indices = @transform_7, window_bounds = array<i64: 1, 64>}, {pipeline_mode = #tpu.pipeline_mode<synchronous>, transform_indices = @transform_8, window_bounds = array<i64: 64, 128>}, {pipeline_mode = #tpu.pipeline_mode<synchronous>, transform_indices = @transform_9, window_bounds = array<i64: 1, 128>}, {pipeline_mode = #tpu.pipeline_mode<synchronous>, transform_indices = @transform_10, window_bounds = array<i64: 128, 64>}, {pipeline_mode = #tpu.pipeline_mode<synchronous>, transform_indices = @transform_11, window_bounds = array<i64: 1, 64>}, {transform_indices = @transform_12, window_bounds = array<i64: 1, 8, 64>}]} {
    %c0 = arith.constant 0 : index
    %0 = memref.load %arg1[%c0] : memref<4xf32, #tpu.memory_space<smem>>
    %c1 = arith.constant 1 : index
    %1 = memref.load %arg1[%c1] : memref<4xf32, #tpu.memory_space<smem>>
    %c2 = arith.constant 2 : index
    %2 = memref.load %arg1[%c2] : memref<4xf32, #tpu.memory_space<smem>>
    %c3 = arith.constant 3 : index
    %3 = memref.load %arg1[%c3] : memref<4xf32, #tpu.memory_space<smem>>
    %c0_0 = arith.constant 0 : index
    %c0_1 = arith.constant 0 : index
    %c0_2 = arith.constant 0 : index
    %4 = vector.load %arg2[%c0_0, %c0_1, %c0_2] : memref<1x8x64xf32, #tpu.memory_space<vmem>>, vector<1x8x64xf32>
    %5 = vector.shape_cast %4 : vector<1x8x64xf32> to vector<8x64xf32>
    %c0_3 = arith.constant 0 : index
    %c0_4 = arith.constant 0 : index
    %c0_5 = arith.constant 0 : index
    %6 = vector.load %arg3[%c0_3, %c0_4, %c0_5] : memref<1x8x8xf32, #tpu.memory_space<vmem>>, vector<1x8x8xf32>
    %7 = vector.shape_cast %6 : vector<1x8x8xf32> to vector<8x8xf32>
    %cst = arith.constant dense<0.000000e+00> : vector<8xf32>
    %8 = vector.multi_reduction <add>, %5, %cst [1] : vector<8x64xf32> to vector<8xf32>
    %9 = vector.shape_cast %8 : vector<8xf32> to vector<8x1xf32>
    %cst_6 = arith.constant 6.400000e+01 : f32
    %10 = vector.broadcast %cst_6 : f32 to vector<8x1xf32>
    %11 = arith.divf %9, %10 : vector<8x1xf32>
    %12 = vector.broadcast %11 : vector<8x1xf32> to vector<8x64xf32>
    %13 = arith.subf %5, %12 : vector<8x64xf32>
    %14 = arith.mulf %13, %13 : vector<8x64xf32>
    %cst_7 = arith.constant dense<0.000000e+00> : vector<8xf32>
    %15 = vector.multi_reduction <add>, %14, %cst_7 [1] : vector<8x64xf32> to vector<8xf32>
    %16 = vector.shape_cast %15 : vector<8xf32> to vector<8x1xf32>
    %cst_8 = arith.constant 6.400000e+01 : f32
    %17 = vector.broadcast %cst_8 : f32 to vector<8x1xf32>
    %18 = arith.divf %16, %17 : vector<8x1xf32>
    %19 = vector.broadcast %11 : vector<8x1xf32> to vector<8x64xf32>
    %20 = arith.subf %5, %19 : vector<8x64xf32>
    %cst_9 = arith.constant 9.99999974E-6 : f32
    %21 = vector.broadcast %cst_9 : f32 to vector<8x1xf32>
    %22 = arith.addf %18, %21 : vector<8x1xf32>
    %23 = math.rsqrt %22 : vector<8x1xf32>
    %24 = vector.broadcast %23 : vector<8x1xf32> to vector<8x64xf32>
    %25 = arith.mulf %20, %24 : vector<8x64xf32>
    %26 = vector.broadcast %0 : f32 to vector<8x64xf32>
    %27 = arith.mulf %26, %25 : vector<8x64xf32>
    %28 = vector.broadcast %1 : f32 to vector<8x64xf32>
    %29 = arith.addf %27, %28 : vector<8x64xf32>
    %30 = arith.truncf %29 : vector<8x64xf32> to vector<8x64xbf16>
    %c0_10 = arith.constant 0 : index
    %c0_11 = arith.constant 0 : index
    %31 = vector.load %arg6[%c0_10, %c0_11] : memref<64x192xbf16, #tpu.memory_space<vmem>>, vector<64x192xbf16>
    %cst_12 = arith.constant dense<0.000000e+00> : vector<8x192xf32>
    %32 = tpu.matmul %30, %31, %cst_12 {dimension_numbers = #tpu.dot_dimension_numbers<[1], [0], [0], [1], [0, 0, 1, 1], [], []>} : vector<8x64xbf16>, vector<64x192xbf16>, vector<8x192xf32> -> vector<8x192xf32>
    %33 = vector.extract_strided_slice %32 {offsets = [0, 0], sizes = [8, 64], strides = [1, 1]} : vector<8x192xf32> to vector<8x64xf32>
    %34 = vector.extract_strided_slice %32 {offsets = [0, 64], sizes = [8, 64], strides = [1, 1]} : vector<8x192xf32> to vector<8x64xf32>
    %35 = vector.extract_strided_slice %32 {offsets = [0, 128], sizes = [8, 64], strides = [1, 1]} : vector<8x192xf32> to vector<8x64xf32>
    %c0_13 = arith.constant 0 : index
    %c0_14 = arith.constant 0 : index
    %36 = vector.load %arg4[%c0_13, %c0_14] : memref<8x64xf32, #tpu.memory_space<vmem>>, vector<8x64xf32>
    %c0_15 = arith.constant 0 : index
    %c0_16 = arith.constant 0 : index
    %37 = vector.load %arg5[%c0_15, %c0_16] : memref<8x64xf32, #tpu.memory_space<vmem>>, vector<8x64xf32>
    %38 = tpu.iota {dimensions = array<i32: 1>} : vector<8x64xi32>
    %c1_i32 = arith.constant 1 : i32
    %39 = vector.broadcast %c1_i32 : i32 to vector<8x64xi32>
    %40 = arith.andi %38, %39 : vector<8x64xi32>
    %c0_i32 = arith.constant 0 : i32
    %41 = vector.broadcast %c0_i32 : i32 to vector<8x64xi32>
    %42 = arith.cmpi eq, %40, %41 : vector<8x64xi32>
    %c63_i32 = arith.constant 63 : i32
    %43 = tpu.dynamic_rotate %33 by %c63_i32 dim 1 : vector<8x64xf32>, i32 -> vector<8x64xf32>
    %c1_i32_17 = arith.constant 1 : i32
    %44 = tpu.dynamic_rotate %33 by %c1_i32_17 dim 1 : vector<8x64xf32>, i32 -> vector<8x64xf32>
    %45 = arith.select %42, %43, %44 : vector<8x64xi1>, vector<8x64xf32>
    %46 = arith.mulf %33, %36 : vector<8x64xf32>
    %47 = arith.mulf %45, %37 : vector<8x64xf32>
    %48 = arith.addf %46, %47 : vector<8x64xf32>
    %49 = arith.truncf %48 : vector<8x64xf32> to vector<8x64xbf16>
    %c63_i32_18 = arith.constant 63 : i32
    %50 = tpu.dynamic_rotate %34 by %c63_i32_18 dim 1 : vector<8x64xf32>, i32 -> vector<8x64xf32>
    %c1_i32_19 = arith.constant 1 : i32
    %51 = tpu.dynamic_rotate %34 by %c1_i32_19 dim 1 : vector<8x64xf32>, i32 -> vector<8x64xf32>
    %52 = arith.select %42, %50, %51 : vector<8x64xi1>, vector<8x64xf32>
    %53 = arith.mulf %34, %36 : vector<8x64xf32>
    %54 = arith.mulf %52, %37 : vector<8x64xf32>
    %55 = arith.addf %53, %54 : vector<8x64xf32>
    %56 = arith.truncf %55 : vector<8x64xf32> to vector<8x64xbf16>
    %57 = arith.truncf %35 : vector<8x64xf32> to vector<8x64xbf16>
    %58 = vector.extract_strided_slice %49 {offsets = [0, 0], sizes = [8, 32], strides = [1, 1]} : vector<8x64xbf16> to vector<8x32xbf16>
    %59 = vector.extract_strided_slice %56 {offsets = [0, 0], sizes = [8, 32], strides = [1, 1]} : vector<8x64xbf16> to vector<8x32xbf16>
    %60 = vector.extract_strided_slice %57 {offsets = [0, 0], sizes = [8, 32], strides = [1, 1]} : vector<8x64xbf16> to vector<8x32xbf16>
    %cst_20 = arith.constant dense<0.000000e+00> : vector<8x8xf32>
    %61 = tpu.matmul %58, %59, %cst_20 {dimension_numbers = #tpu.dot_dimension_numbers<[1], [1], [0], [0], [0, 0, 1, 0], [], []>} : vector<8x32xbf16>, vector<8x32xbf16>, vector<8x8xf32> -> vector<8x8xf32>
    %62 = arith.addf %61, %7 : vector<8x8xf32>
    %cst_21 = arith.constant dense<0xFF800000> : vector<8xf32>
    %63 = vector.multi_reduction <maximumf>, %62, %cst_21 [1] : vector<8x8xf32> to vector<8xf32>
    %64 = vector.shape_cast %63 : vector<8xf32> to vector<8x1xf32>
    %65 = vector.broadcast %64 : vector<8x1xf32> to vector<8x8xf32>
    %66 = arith.subf %62, %65 : vector<8x8xf32>
    %67 = math.exp %66 : vector<8x8xf32>
    %cst_22 = arith.constant dense<0.000000e+00> : vector<8xf32>
    %68 = vector.multi_reduction <add>, %67, %cst_22 [1] : vector<8x8xf32> to vector<8xf32>
    %69 = vector.shape_cast %68 : vector<8xf32> to vector<8x1xf32>
    %70 = tpu.reciprocal %69 {approx = true} : vector<8x1xf32> -> vector<8x1xf32>
    %71 = vector.broadcast %70 : vector<8x1xf32> to vector<8x8xf32>
    %72 = arith.mulf %67, %71 : vector<8x8xf32>
    %73 = arith.truncf %72 : vector<8x8xf32> to vector<8x8xbf16>
    %cst_23 = arith.constant dense<0.000000e+00> : vector<8x32xf32>
    %74 = tpu.matmul %73, %60, %cst_23 {dimension_numbers = #tpu.dot_dimension_numbers<[1], [0], [0], [1], [0, 0, 1, 1], [], []>} : vector<8x8xbf16>, vector<8x32xbf16>, vector<8x32xf32> -> vector<8x32xf32>
    %75 = arith.truncf %74 : vector<8x32xf32> to vector<8x32xbf16>
    %c0_24 = arith.constant 0 : index
    %c0_25 = arith.constant 0 : index
    %76 = vector.load %arg14[%c0_24, %c0_25] : memref<8x64xbf16, #tpu.memory_space<vmem>>, vector<8x32xbf16>
    tpu.vector_store %arg14[%c0_24, %c0_25], %75 {strides = array<i32>} : memref<8x64xbf16, #tpu.memory_space<vmem>>, vector<8x32xbf16>,
    %77 = vector.extract_strided_slice %49 {offsets = [0, 32], sizes = [8, 32], strides = [1, 1]} : vector<8x64xbf16> to vector<8x32xbf16>
    %78 = vector.extract_strided_slice %56 {offsets = [0, 32], sizes = [8, 32], strides = [1, 1]} : vector<8x64xbf16> to vector<8x32xbf16>
    %79 = vector.extract_strided_slice %57 {offsets = [0, 32], sizes = [8, 32], strides = [1, 1]} : vector<8x64xbf16> to vector<8x32xbf16>
    %cst_26 = arith.constant dense<0.000000e+00> : vector<8x8xf32>
    %80 = tpu.matmul %77, %78, %cst_26 {dimension_numbers = #tpu.dot_dimension_numbers<[1], [1], [0], [0], [0, 0, 1, 0], [], []>} : vector<8x32xbf16>, vector<8x32xbf16>, vector<8x8xf32> -> vector<8x8xf32>
    %81 = arith.addf %80, %7 : vector<8x8xf32>
    %cst_27 = arith.constant dense<0xFF800000> : vector<8xf32>
    %82 = vector.multi_reduction <maximumf>, %81, %cst_27 [1] : vector<8x8xf32> to vector<8xf32>
    %83 = vector.shape_cast %82 : vector<8xf32> to vector<8x1xf32>
    %84 = vector.broadcast %83 : vector<8x1xf32> to vector<8x8xf32>
    %85 = arith.subf %81, %84 : vector<8x8xf32>
    %86 = math.exp %85 : vector<8x8xf32>
    %cst_28 = arith.constant dense<0.000000e+00> : vector<8xf32>
    %87 = vector.multi_reduction <add>, %86, %cst_28 [1] : vector<8x8xf32> to vector<8xf32>
    %88 = vector.shape_cast %87 : vector<8xf32> to vector<8x1xf32>
    %89 = tpu.reciprocal %88 {approx = true} : vector<8x1xf32> -> vector<8x1xf32>
    %90 = vector.broadcast %89 : vector<8x1xf32> to vector<8x8xf32>
    %91 = arith.mulf %86, %90 : vector<8x8xf32>
    %92 = arith.truncf %91 : vector<8x8xf32> to vector<8x8xbf16>
    %cst_29 = arith.constant dense<0.000000e+00> : vector<8x32xf32>
    %93 = tpu.matmul %92, %79, %cst_29 {dimension_numbers = #tpu.dot_dimension_numbers<[1], [0], [0], [1], [0, 0, 1, 1], [], []>} : vector<8x8xbf16>, vector<8x32xbf16>, vector<8x32xf32> -> vector<8x32xf32>
    %94 = arith.truncf %93 : vector<8x32xf32> to vector<8x32xbf16>
    %c0_30 = arith.constant 0 : index
    %c32 = arith.constant 32 : index
    %95 = vector.load %arg14[%c0_30, %c32] : memref<8x64xbf16, #tpu.memory_space<vmem>>, vector<8x32xbf16>
    tpu.vector_store %arg14[%c0_30, %c32], %94 {strides = array<i32>} : memref<8x64xbf16, #tpu.memory_space<vmem>>, vector<8x32xbf16>,
    %c0_31 = arith.constant 0 : index
    %c0_32 = arith.constant 0 : index
    %96 = vector.load %arg14[%c0_31, %c0_32] : memref<8x64xbf16, #tpu.memory_space<vmem>>, vector<8x64xbf16>
    %c0_33 = arith.constant 0 : index
    %c0_34 = arith.constant 0 : index
    %97 = vector.load %arg7[%c0_33, %c0_34] : memref<64x64xbf16, #tpu.memory_space<vmem>>, vector<64x64xbf16>
    %cst_35 = arith.constant dense<0.000000e+00> : vector<8x64xf32>
    %98 = tpu.matmul %96, %97, %cst_35 {dimension_numbers = #tpu.dot_dimension_numbers<[1], [0], [0], [1], [0, 0, 1, 1], [], []>} : vector<8x64xbf16>, vector<64x64xbf16>, vector<8x64xf32> -> vector<8x64xf32>
    %c0_36 = arith.constant 0 : index
    %c0_37 = arith.constant 0 : index
    %99 = vector.load %arg8[%c0_36, %c0_37] : memref<1x64xf32, #tpu.memory_space<vmem>>, vector<1x64xf32>
    %100 = vector.broadcast %99 : vector<1x64xf32> to vector<8x64xf32>
    %101 = arith.addf %98, %100 : vector<8x64xf32>
    %102 = arith.addf %5, %101 : vector<8x64xf32>
    %cst_38 = arith.constant dense<0.000000e+00> : vector<8xf32>
    %103 = vector.multi_reduction <add>, %102, %cst_38 [1] : vector<8x64xf32> to vector<8xf32>
    %104 = vector.shape_cast %103 : vector<8xf32> to vector<8x1xf32>
    %cst_39 = arith.constant 6.400000e+01 : f32
    %105 = vector.broadcast %cst_39 : f32 to vector<8x1xf32>
    %106 = arith.divf %104, %105 : vector<8x1xf32>
    %107 = vector.broadcast %106 : vector<8x1xf32> to vector<8x64xf32>
    %108 = arith.subf %102, %107 : vector<8x64xf32>
    %109 = arith.mulf %108, %108 : vector<8x64xf32>
    %cst_40 = arith.constant dense<0.000000e+00> : vector<8xf32>
    %110 = vector.multi_reduction <add>, %109, %cst_40 [1] : vector<8x64xf32> to vector<8xf32>
    %111 = vector.shape_cast %110 : vector<8xf32> to vector<8x1xf32>
    %cst_41 = arith.constant 6.400000e+01 : f32
    %112 = vector.broadcast %cst_41 : f32 to vector<8x1xf32>
    %113 = arith.divf %111, %112 : vector<8x1xf32>
    %114 = vector.broadcast %106 : vector<8x1xf32> to vector<8x64xf32>
    %115 = arith.subf %102, %114 : vector<8x64xf32>
    %cst_42 = arith.constant 9.99999974E-6 : f32
    %116 = vector.broadcast %cst_42 : f32 to vector<8x1xf32>
    %117 = arith.addf %113, %116 : vector<8x1xf32>
    %118 = math.rsqrt %117 : vector<8x1xf32>
    %119 = vector.broadcast %118 : vector<8x1xf32> to vector<8x64xf32>
    %120 = arith.mulf %115, %119 : vector<8x64xf32>
    %121 = vector.broadcast %2 : f32 to vector<8x64xf32>
    %122 = arith.mulf %121, %120 : vector<8x64xf32>
    %123 = vector.broadcast %3 : f32 to vector<8x64xf32>
    %124 = arith.addf %122, %123 : vector<8x64xf32>
    %125 = arith.truncf %124 : vector<8x64xf32> to vector<8x64xbf16>
    %c0_43 = arith.constant 0 : index
    %c0_44 = arith.constant 0 : index
    %126 = vector.load %arg9[%c0_43, %c0_44] : memref<64x128xbf16, #tpu.memory_space<vmem>>, vector<64x128xbf16>
    %cst_45 = arith.constant dense<0.000000e+00> : vector<8x128xf32>
    %127 = tpu.matmul %125, %126, %cst_45 {dimension_numbers = #tpu.dot_dimension_numbers<[1], [0], [0], [1], [0, 0, 1, 1], [], []>} : vector<8x64xbf16>, vector<64x128xbf16>, vector<8x128xf32> -> vector<8x128xf32>
    %c0_46 = arith.constant 0 : index
    %c0_47 = arith.constant 0 : index
    %128 = vector.load %arg10[%c0_46, %c0_47] : memref<1x128xf32, #tpu.memory_space<vmem>>, vector<1x128xf32>
    %129 = vector.broadcast %128 : vector<1x128xf32> to vector<8x128xf32>
    %130 = arith.addf %127, %129 : vector<8x128xf32>
    %cst_48 = arith.constant 5.000000e-01 : f32
    %131 = vector.broadcast %cst_48 : f32 to vector<8x128xf32>
    %132 = arith.mulf %131, %130 : vector<8x128xf32>
    %cst_49 = arith.constant 0.707106769 : f32
    %133 = vector.broadcast %cst_49 : f32 to vector<8x128xf32>
    %134 = arith.mulf %130, %133 : vector<8x128xf32>
    %135 = math.erf %134 : vector<8x128xf32>
    %cst_50 = arith.constant 1.000000e+00 : f32
    %136 = vector.broadcast %cst_50 : f32 to vector<8x128xf32>
    %137 = arith.addf %136, %135 : vector<8x128xf32>
    %138 = arith.mulf %132, %137 : vector<8x128xf32>
    %139 = arith.truncf %138 : vector<8x128xf32> to vector<8x128xbf16>
    %c0_51 = arith.constant 0 : index
    %c0_52 = arith.constant 0 : index
    %140 = vector.load %arg11[%c0_51, %c0_52] : memref<128x64xbf16, #tpu.memory_space<vmem>>, vector<128x64xbf16>
    %cst_53 = arith.constant dense<0.000000e+00> : vector<8x64xf32>
    %141 = tpu.matmul %139, %140, %cst_53 {dimension_numbers = #tpu.dot_dimension_numbers<[1], [0], [0], [1], [0, 0, 1, 1], [], []>} : vector<8x128xbf16>, vector<128x64xbf16>, vector<8x64xf32> -> vector<8x64xf32>
    %c0_54 = arith.constant 0 : index
    %c0_55 = arith.constant 0 : index
    %142 = vector.load %arg12[%c0_54, %c0_55] : memref<1x64xf32, #tpu.memory_space<vmem>>, vector<1x64xf32>
    %143 = vector.broadcast %142 : vector<1x64xf32> to vector<8x64xf32>
    %144 = arith.addf %141, %143 : vector<8x64xf32>
    %145 = arith.addf %102, %144 : vector<8x64xf32>
    %c0_56 = arith.constant 0 : index
    %c0_57 = arith.constant 0 : index
    %c0_58 = arith.constant 0 : index
    %146 = vector.load %arg13[%c0_56, %c0_57, %c0_58] : memref<1x8x64xf32, #tpu.memory_space<vmem>>, vector<1x8x64xf32>
    %147 = vector.shape_cast %146 : vector<1x8x64xf32> to vector<8x64xf32>
    %148 = vector.shape_cast %145 : vector<8x64xf32> to vector<1x8x64xf32>
    tpu.vector_store %arg13[%c0_56, %c0_57, %c0_58], %148 {strides = array<i32>} : memref<1x8x64xf32, #tpu.memory_space<vmem>>, vector<1x8x64xf32>,
    return
  }
  func.func @transform_0(%arg0: i32) -> i32 {
    %c0_i32 = arith.constant 0 : i32
    %c0_i32_0 = arith.constant 0 : i32
    return %c0_i32 : i32
  }
  func.func @transform_1(%arg0: i32) -> (i32, i32, i32) {
    %c0_i32 = arith.constant 0 : i32
    %c0_i32_0 = arith.constant 0 : i32
    %c0_i32_1 = arith.constant 0 : i32
    return %arg0, %c0_i32, %c0_i32_0 : i32, i32, i32
  }
  func.func @transform_2(%arg0: i32) -> (i32, i32, i32) {
    %c0_i32 = arith.constant 0 : i32
    %c0_i32_0 = arith.constant 0 : i32
    %c0_i32_1 = arith.constant 0 : i32
    return %arg0, %c0_i32, %c0_i32_0 : i32, i32, i32
  }
  func.func @transform_3(%arg0: i32) -> (i32, i32) {
    %c0_i32 = arith.constant 0 : i32
    %c0_i32_0 = arith.constant 0 : i32
    %c0_i32_1 = arith.constant 0 : i32
    return %c0_i32, %c0_i32_0 : i32, i32
  }
  func.func @transform_4(%arg0: i32) -> (i32, i32) {
    %c0_i32 = arith.constant 0 : i32
    %c0_i32_0 = arith.constant 0 : i32
    %c0_i32_1 = arith.constant 0 : i32
    return %c0_i32, %c0_i32_0 : i32, i32
  }
  func.func @transform_5(%arg0: i32) -> (i32, i32) {
    %c0_i32 = arith.constant 0 : i32
    %c0_i32_0 = arith.constant 0 : i32
    %c0_i32_1 = arith.constant 0 : i32
    return %c0_i32, %c0_i32_0 : i32, i32
  }
  func.func @transform_6(%arg0: i32) -> (i32, i32) {
    %c0_i32 = arith.constant 0 : i32
    %c0_i32_0 = arith.constant 0 : i32
    %c0_i32_1 = arith.constant 0 : i32
    return %c0_i32, %c0_i32_0 : i32, i32
  }
  func.func @transform_7(%arg0: i32) -> (i32, i32) {
    %c0_i32 = arith.constant 0 : i32
    %c0_i32_0 = arith.constant 0 : i32
    %c0_i32_1 = arith.constant 0 : i32
    return %c0_i32, %c0_i32_0 : i32, i32
  }
  func.func @transform_8(%arg0: i32) -> (i32, i32) {
    %c0_i32 = arith.constant 0 : i32
    %c0_i32_0 = arith.constant 0 : i32
    %c0_i32_1 = arith.constant 0 : i32
    return %c0_i32, %c0_i32_0 : i32, i32
  }
  func.func @transform_9(%arg0: i32) -> (i32, i32) {
    %c0_i32 = arith.constant 0 : i32
    %c0_i32_0 = arith.constant 0 : i32
    %c0_i32_1 = arith.constant 0 : i32
    return %c0_i32, %c0_i32_0 : i32, i32
  }
  func.func @transform_10(%arg0: i32) -> (i32, i32) {
    %c0_i32 = arith.constant 0 : i32
    %c0_i32_0 = arith.constant 0 : i32
    %c0_i32_1 = arith.constant 0 : i32
    return %c0_i32, %c0_i32_0 : i32, i32
  }
  func.func @transform_11(%arg0: i32) -> (i32, i32) {
    %c0_i32 = arith.constant 0 : i32
    %c0_i32_0 = arith.constant 0 : i32
    %c0_i32_1 = arith.constant 0 : i32
    return %c0_i32, %c0_i32_0 : i32, i32
  }
  func.func @transform_12(%arg0: i32) -> (i32, i32, i32) {
    %c0_i32 = arith.constant 0 : i32
    %c0_i32_0 = arith.constant 0 : i32
    %c0_i32_1 = arith.constant 0 : i32
    return %arg0, %c0_i32, %c0_i32_0 : i32, i32, i32
  }
}

</mosaic_0001>

<bundles_post_ra>
// kernel: tpu_custom_call.1
= control target key start
LH: loop header
LB: loop body
LE: loop exit
PB: predicated region body
PF: predicated region fallthrough
CT: control target
= control target key end

     0   :  { %s2199_s0 = inlined_call_operand.vmem [shape: f32[4], index: 0, kind: input, shape index: {}]   ;;  %s2200_s1 = inlined_call_operand.hbm [shape: f32[2,8,64], index: 1, kind: input, shape index: {}]   ;;  %s2201_s2 = inlined_call_operand.hbm [shape: f32[2,8,8], index: 2, kind: input, shape index: {}]   ;;  %s2202_s3 = inlined_call_operand.hbm [shape: f32[8,64], index: 3, kind: input, shape index: {}]   ;;  %s2203_s4 = inlined_call_operand.hbm [shape: f32[8,64], index: 4, kind: input, shape index: {}]   ;;  %s2204_s5 = inlined_call_operand.vmem [shape: bf16[64,192], index: 5, kind: input, shape index: {}]   ;;  %s2205_s6 = inlined_call_operand.vmem [shape: bf16[64,64], index: 6, kind: input, shape index: {}]   ;;  %s2206_s7 = inlined_call_operand.vmem [shape: f32[1,64], index: 7, kind: input, shape index: {}]   ;;  %s2207_s8 = inlined_call_operand.hbm [shape: bf16[64,128], index: 8, kind: input, shape index: {}]   ;;  %s2208_s9 = inlined_call_operand.vmem [shape: f32[1,128], index: 9, kind: input, shape index: {}]   ;;  %s2209_s10 = inlined_call_operand.vmem [shape: bf16[128,64], index: 10, kind: input, shape index: {}]   ;;  %s2210_s11 = inlined_call_operand.vmem [shape: f32[1,64], index: 11, kind: input, shape index: {}]   ;;  %s2211_s12 = inlined_call_operand.hbm [shape: f32[2,8,64], index: 12, kind: output, shape index: {}]  }
   0x1   :  { %2220 = sst [smem:[#allocation28_spill]] %s2199_s0 }
   0x2   :  { %2221 = sst [smem:[#allocation29_spill]] %s2202_s3 }
   0x3   :  { %2222 = sst [smem:[#allocation30_spill]] %s2203_s4 }
   0x4   :  { %2223 = sst [smem:[#allocation31_spill]] %s2207_s8 }
   0x5   :  { %17 = vsyncpa [#allocation6], 0 }
   0x6   :  { %18 = vsyncpa [#allocation4], 0 }
   0x7   :  { %20 = vsyncpa [#allocation4 + $0x1], 0 }
   0x8   :  { %21 = vsyncpa [#allocation9], 0 }
   0x9   :  { %23 = vsyncpa [#allocation9 + $0x1], 0 }
   0xa   :  { %24 = vsyncpa [#allocation12], 0 }
   0xb   :  { %25 = vsyncpa [#allocation5], 0 }
   0xc   :  { %27 = vsyncpa [#allocation5 + $0x1], 0  ;;  %s1844_s21 = smov 0   ;;  %s1846_s22 = smov 0  }
   0xd   :  { %s1848_s23 = smov 0   ;;  %s1850_s24 = smov 0  }
   0xe LB: > { %2224 = sst [smem:[#allocation21_spill]] %s1753_s21  ;;  %s1868_s28 = sadd.s32 4294967295, %s1765_s24   ;;  %s1765_s24 = sphi %s1850_s24, %s2249_s24   ;;  %s1761_s23 = sphi %s1848_s23, %s2251_s23   ;;  %s1757_s22 = sphi %s1846_s22, %s2253_s22   ;;  %s1753_s21 = sphi %s1844_s21, %s2252_s21  }
   0xf   : > { %2225 = sst [smem:[#allocation22_spill]] %s1761_s23  ;;  %p1245_p0 = scmp.ge.s32.totalorder %s1765_s24, 1 }
  0x10   : > { %2226 = sst [smem:[#allocation23_spill]] %s1765_s24  ;;  %p75_p1 = scmp.eq.s32.totalorder %s1868_s28, 0 }
  0x11   : > { %s2227_s3 = sld [smem:[#allocation29_spill]]  ;;  %p326_p2 = scmp.lt.s32.totalorder %s1765_s24, 3 }
  0x12   : > { %s1767_s30 = smov [#allocation10]   ;;  %s2229_s4 = sld [smem:[#allocation30_spill]] }
  0x13   : > { %p1873_p3 = pnand %p1245_p0, %p326_p2  ;;  %s350_s13 = sshll.u32 %s1767_s30, 4  ;;  %s351_s13 = int_to_ptr.vmem [resolvable:$true] %s350_s13 }
  0x14   : > { %s1768_s18 = smov [#allocation11]   ;;  %s2231_s0 = sld [smem:[#allocation28_spill]] }
  0x15   : > { %p1421_p5 = pneg %p1873_p3  ;;  %s362_s19 = sshll.u32 %s1768_s18, 4  ;;  %s363_s19 = int_to_ptr.vmem [resolvable:$true] %s362_s19 }
  0x16   : > { %s2232_s8 = sld [smem:[#allocation31_spill]]  ;;  %s1769_s18 = smov [#allocation3]  }
  0x17   : > { %s348_s27 = sshll.u32 %s2227_s3, 4  ;;  %p1885_p6 = pnand %p1421_p5, %p75_p1  ;;  %s349_s27 = int_to_ptr.hbm [resolvable:$true] %s348_s27 }
  0x18   : > { %s360_s16 = sshll.u32 %s2229_s4, 4  ;;  %s1770_s20 = smov [#allocation13]   ;;  %s361_s16 = int_to_ptr.hbm [resolvable:$true] %s360_s16 }
  0x19   : > { %1427 = dma.hbm_to_vmem [thread:$0]  (!%p1885_p6), %s349_s27, 128, %s351_s13, [#allocation9]  }
  0x1a   : > { %s338_s26 = sshll.u32 %s2231_s0, 4  ;;  %s382_s25 = sshll.u32 %s1770_s20, 4  ;;  %s339_s26 = int_to_ptr.vmem [resolvable:$true] %s338_s26  ;;  %s383_s25 = int_to_ptr.vmem [resolvable:$true] %s382_s25 }
  0x1b   : > { %1430 = dma.hbm_to_vmem [thread:$0]  (!%p1885_p6), %s361_s16, 128, %s363_s19, [#allocation12]  }
  0x1c   : > { %s380_s15 = sshll.u32 %s2232_s8, 4  ;;  %s1771_s27 = smov 64   ;;  %s381_s15 = int_to_ptr.hbm [resolvable:$true] %s380_s15 }
  0x1d   : > { %1424 = dma.vmem_to_smem (!%p1885_p6), %s339_s26, 16, %s1769_s18, [#allocation6]  }
  0x1e   : > { %s1772_s13 = smov 4   ;;  %s1244_s16 = sadd.s32 4294967294, %s1765_s24  }
  0x1f   : > { %1433 = dma.hbm_to_vmem [thread:$0]  (!%p1885_p6), %s381_s15, 512, %s383_s25, [#allocation12], %s1771_s27, %s1771_s27, %s1772_s13  }
  0x20   : > { %s1905_s19 = sadd.s32 1, %s1765_s24   ;;  %s61_s26 = sadd.s32 1, %s1761_s23 }
  0x21   : > { %2233 = sst [smem:[#allocation24_spill]] %s1905_s19  ;;  %s58_s30 = ssub.s32 %s1765_s24, %s1905_s19 }
  0x22   : > { %p59_p7 = scmp.eq.s32.totalorder %s58_s30, 0  ;;  %p68_p8 = scmp.ne.s32.totalorder %s1761_s23, %s1757_s22 }
  0x23   : > { %p69_p9 = scmp.eq.s32.totalorder %s1765_s24, 0  ;;  %p74_p10 = scmp.ne.s32.totalorder %s1757_s22, %s1753_s21 }
  0x24   : > { %s1916_s14 = scalar_select %p59_p7, %s1761_s23, %s61_s26  }
  0x25   : > { %p1918_p11 = por %p69_p9, %p68_p8  ;;  %p1924_p12 = por %p75_p1, %p74_p10 }
  0x26   : > { %2234 = sst [smem:[#allocation25_spill]] %s1916_s14  ;;  %p313_p13 = scmp.eq.s32.totalorder %s1868_s28, 1 }
  0x27   : > { %p319_p0 = scmp.eq.s32.totalorder %s1244_s16, 1  ;;  %p1449_p2 = scmp.lt.s32.totalorder %s1765_s24, 2 }
  0x28   : > { %s405_s15 = sand.u32 1, %s1761_s23   ;;  %p1931_p5 = por %p313_p13, %p68_p8 }
  0x29   : > { %p1935_p6 = por %p319_p0, %p74_p10  ;;  %s1939_s27 = sshll.u32 %s405_s15, 3 }
  0x2a   : > { %s2237_s20 = scalar_select %p1931_p5, 1, 0 }
  0x2b   : > { %s2239_s25 = scalar_select %p1935_p6, 1, 0 }
  0x2c   : > { %2238 = sst [smem:[#allocation26_spill]] %s2237_s20  ;;  %s1252_s13 = sshll.u32 %s1765_s24, 3 }
  0x2d   : > { %2240 = sst [smem:[#allocation27_spill]] %s2239_s25  ;;  %s413_s0 = scalar_lea.hbm %s2200_s1, %s1252_s13 }
  0x2e   : > { %s409_s3 = scalar_lea.vmem [#allocation7], %s1939_s27  ;;  %s415_s4 = sshll.u32 %s413_s0, 4  ;;  %s416_s4 = int_to_ptr.hbm [resolvable:$true] %s415_s4 }
  0x2f   : > { %s417_s16 = sshll.u32 %s409_s3, 4  ;;  %p1948_p7 = pnand %p1449_p2, %p1918_p11  ;;  %s418_s16 = int_to_ptr.vmem [resolvable:$true] %s417_s16 }
  0x30   : > { %s432_s19 = scalar_lea.hbm %s2201_s2, %s1252_s13  ;;  %s424_s25 = sand.u32 1, %s1765_s24  }
  0x31   : > { %s406_s21 = scalar_lea.sflag [#allocation4], %s405_s15  ;;  %s1623_s30 = sshra.s32 %s416_s4, 4  ;;  %s1624_s30 = int_to_ptr.hbm [resolvable:$true] %s1623_s30 }
  0x32   : > { %s1625_s26 = scalar_lea.hbm %s1624_s30, 8  ;;  %p1627_p9 = pneg %p1948_p7 }
  0x33   : > { %p1626_p8 = scmp.ne.s32.totalorder %s1624_s30, %s1625_s26  ;;  %s1630_s18 = scalar_lea.hbm %s2200_s1, 16 }
  0x34   : > { %p1631_p13 = scmp.lt.s32.totalorder %s1624_s30, %s2200_s1  ;;  %p1632_p0 = scmp.lt.s32.totalorder %s1630_s18, %s1625_s26 }
  0x35   : > { %p1628_p10 = pnand %p1627_p9, %p1626_p8 }
  0x36   : > { %p1633_p2 = por %p1632_p0, %p1631_p13 }
  0x37   : > { %p1629_p11 = pneg %p1628_p10 }
  0x39   : > { %p1634_p4 = pnand %p1633_p2, %p1629_p11 }
  0x3b   : > { %1637 = shalt.err (!%p1634_p4)
}
  0x3c   : > { %1437 = dma.hbm_to_vmem [thread:$0]  (!%p1948_p7), %s416_s4, 128, %s418_s16, %s406_s21  }
  0x3d   : > { %s434_s15 = sshll.u32 %s432_s19, 4  ;;  %s428_s13 = scalar_lea.vmem [#allocation8], %s1939_s27  ;;  %s435_s15 = int_to_ptr.hbm [resolvable:$true] %s434_s15 }
  0x3e   : > { %s436_s24 = sshll.u32 %s428_s13, 4  ;;  %s425_s0 = scalar_lea.sflag [#allocation9], %s424_s25  ;;  %s437_s24 = int_to_ptr.vmem [resolvable:$true] %s436_s24 }
  0x3f   : > { %s1653_s3 = sshra.s32 %s435_s15, 4  ;;  %s1660_s18 = scalar_lea.hbm %s2201_s2, 16  ;;  %s1654_s3 = int_to_ptr.hbm [resolvable:$true] %s1653_s3 }
  0x40   : > { %s1655_s20 = scalar_lea.hbm %s1654_s3, 8  ;;  %p1661_p4 = scmp.lt.s32.totalorder %s1654_s3, %s2201_s2 }
  0x41   : > { %p1656_p8 = scmp.ne.s32.totalorder %s1654_s3, %s1655_s20  ;;  %p1662_p13 = scmp.lt.s32.totalorder %s1660_s18, %s1655_s20 }
  0x43   : > { %p1658_p10 = pnand %p1656_p8, %p1627_p9  ;;  %p1663_p0 = por %p1662_p13, %p1661_p4 }
  0x45   : > { %p1659_p11 = pneg %p1658_p10 }
  0x47   : > { %p1664_p2 = pnand %p1663_p0, %p1659_p11 }
  0x49   : > { %1667 = shalt.err (!%p1664_p2)
}
  0x4a   : > { %1440 = dma.hbm_to_vmem [thread:$0]  (!%p1948_p7), %s435_s15, 128, %s437_s24, %s425_s0  }
  0x4b   : > { %445 = sbr.rel (%p1873_p3) target bundleno = 2539 (0x9eb), region = 68 }
  0x50   : > { %1728 = dma.done.wait (%p75_p1), [#allocation6], 16  }
  0x51   : > { %1730 = vsyncadd (%p75_p1), [#allocation6], 4294967280  ;;  %s1988_s21 = sand.u32 1, %s1757_s22  }
  0x52   : > { %s1991_s19 = sshll.u32 %s1988_s21, 3  ;;  %s453_s8 = scalar_lea.sflag [#allocation4], %s1988_s21 }
  0x53   : > { %s456_s24 = scalar_lea.vmem [#allocation7], %s1991_s19 }
  0x54   : > { %1732 = dma.done.wait (%p1924_p12), %s453_s8, 128  }
  0x55   : > { %1734 = vsyncadd (%p1924_p12), %s453_s8, 4294967168  ;;  %s462_s29 = sand.u32 1, %s1868_s28   ;;  %s466_s25 = scalar_lea.vmem [#allocation8], %s1991_s19 }
  0x56   : > { %s463_s20 = scalar_lea.sflag [#allocation9], %s462_s29 }
  0x57   : > { %1736 = dma.done.wait (%p1924_p12), %s463_s20, 128  }
  0x58   : > { %1738 = vsyncadd (%p1924_p12), %s463_s20, 4294967168 }
  0x59   : > { %1740 = dma.done.wait (%p75_p1), [#allocation9], 128  }
  0x5a   : > { %1742 = vsyncadd (%p75_p1), [#allocation9], 4294967168 }
  0x5b   : > { %1744 = dma.done.wait (%p75_p1), [#allocation12], 640  }
  0x5c   : > { %1746 = vsyncadd (%p75_p1), [#allocation12], 4294966656 }
  0x5d   : > { %487 = sfence }
  0x5e   : > { %v2013_v0 = vld [vmem:[%s456_s24] sm:$0xff]  ;;  %vm536_vm0 = vcmask 523264   ;;  %v1773_v2 = vmov 64.0   ;;  %v1382_v15 = vld [vmem:[%s2204_s5 + $0x34] sm:$0xf0]  ;;  %s530_s29 = sld [smem:[#allocation3]] }
  0x5f   : > { %v537_v1 = vsel %vm536_vm0, %v2013_v0, 0.0  ;;  %1502 = vrcp.f32 %v1773_v2  ;;  %v1292_v14 = vld [vmem:[%s2204_s5 + $0x30] sm:$0xf]  ;;  %v1381_v16 = vld [vmem:[%s2204_s5 + $0x34] sm:$0xf]  ;;  %s1263_s20 = sld [smem:[#allocation3 + $0x1]] }
  0x60   : > { %538 = vadd.xlane.f32.xlu0 %v537_v1  ;;  %v1293_v17 = vor.u32 %v1382_v15, %v1292_v14  ;;  %v1294_v18 = vld [vmem:[%s2204_s5 + $0x38] sm:$0xf0]  ;;  %v1284_v20 = vld [vmem:[%s2204_s5 + $0x20] sm:$0xf]  ;;  %v1380_v21 = vld [vmem:[%s2204_s5 + $0x24] sm:$0xf0] }
  0x61   : > { %v1297_v19 = vor.u32 %v1381_v16, %v1294_v18  ;;  %v1379_v22 = vld [vmem:[%s2204_s5 + $0x24] sm:$0xf]  ;;  %v1285_v23 = vor.u32 %v1380_v21, %v1284_v20  ;;  %v1286_v24 = vld [vmem:[%s2204_s5 + $0x28] sm:$0xf0]  ;;  %v1276_v26 = vld [vmem:[%s2204_s5 + $0x10] sm:$0xf] }
  0x62   : > { %626 = vmatpush.bf16.msra.mxu0 %v1293_v17  ;;  %v1289_v25 = vor.u32 %v1379_v22, %v1286_v24  ;;  %v1378_v27 = vld [vmem:[%s2204_s5 + $0x14] sm:$0xf0]  ;;  %v1377_v28 = vld [vmem:[%s2204_s5 + $0x14] sm:$0xf]  ;;  %v1278_v30 = vld [vmem:[%s2204_s5 + $0x18] sm:$0xf0] }
  0x63   : > { %639 = vmatpush.bf16.msra.mxu1 %v1297_v19  ;;  %v1277_v29 = vor.u32 %v1378_v27, %v1276_v26  ;;  %v1268_v31 = vld [vmem:[%s2204_s5] sm:$0xf]  ;;  %v1376_v32 = vld [vmem:[%s2204_s5 + $0x4] sm:$0xf0]  ;;  %v1281_v33 = vor.u32 %v1377_v28, %v1278_v30  ;;  %v1375_v34 = vld [vmem:[%s2204_s5 + $0x4] sm:$0xf] }
  0x64   : > { %v1270_v35 = vld [vmem:[%s2204_s5 + $0x8] sm:$0xf0]  ;;  %v1269_v36 = vor.u32 %v1376_v32, %v1268_v31  ;;  %v566_v48 = vstv %s530_s29  ;;  %s1774_s17 = smov 64   ;;  %vm654_vm5 = vcmask 1048064   ;;  %s1775_s27 = smov 65   ;;  %v648_v1 = vld [vmem:[#allocation10] sm:$0xff] }
  0x65   : > { %v1503_v3 = vpop.eup %1502  ;;  %v1273_v37 = vor.u32 %v1375_v34, %v1270_v35  ;;  %v568_v50 = vstv %s1263_s20  ;;  %s1776_s16 = smov 127   ;;  %s1777_s14 = smov 32   ;;  %vm709_vm7 = vcmask 261120   ;;  %vm745_vm8 = vcmask 1043456  }
  0x66   : > { %v541_v4 = vmul.f32 64.0, %v1503_v3  ;;  %vm545_vm1 = vweird.f32 %v1503_v3  ;;  %627 = vmatpush.bf16.msra.mxu0 %v1285_v23  ;;  %s1778_s15 = smov 96   ;;  %vm729_vm9 = vcmask 64512   ;;  %vm763_vm10 = vcmask 257024   ;;  %s1264_s24 = sld [smem:[#allocation3 + $0x2]] }
  0x67   : > { %640 = vmatpush.bf16.msra.mxu1 %v1289_v25  ;;  %vm832_vm11 = vcmask 519424   ;;  %s1265_s29 = sld [smem:[#allocation3 + $0x3]]  ;;  %s1372_s20 = sshll.u32 %s1868_s28, 3 }
  0x68   : > { %v542_v5 = vsub.f32 1.0, %v541_v4  ;;  %s528_s13 = scalar_lea.vmem [#allocation14], %s1991_s19  ;;  %s1096_s28 = scalar_lea.sflag [#allocation5], %s1988_s21 }
  0x69   : > { %s1108_s0 = sshll.u32 %s528_s13, 4  ;;  %s1703_s19 = scalar_lea.hbm %s2211_s12, 16  ;;  %s1109_s0 = int_to_ptr.vmem [resolvable:$true] %s1108_s0 }
  0x6a   : > { %v543_v6 = vmul.f32 %v1503_v3, %v542_v5  ;;  %628 = vmatpush.bf16.msra.mxu0 %v1277_v29  ;;  %v650_v5 = vlaneseq }
  0x6b   : > { %641 = vmatpush.bf16.msra.mxu1 %v1281_v33 }
  0x6c   : > { %v544_v7 = vadd.f32 %v1503_v3, %v543_v6  ;;  %v651_v6 = vand.u32 127, %v650_v5 }
  0x6e   : > { %v2017_v8 = vsel %vm545_vm1, %v1503_v3, %v544_v7  ;;  %629 = vmatpush.bf16.msra.mxu0 %v1269_v36  ;;  %v652_v7 = vand.u32 1, %v651_v6  ;;  %v1386_v6 = vld [vmem:[%s2205_s6 + $0x18] sm:$0xff] }
  0x6f   : > { %642 = vmatpush.bf16.msra.mxu1 %v1273_v37 }
  0x70   : > { %vm2083_vm6 = vcmp.eq.s32.totalorder %v652_v7, 0  ;;  %v1385_v7 = vld [vmem:[%s2205_s6 + $0x10] sm:$0xff] }
  0x72   : > { %878 = vmatpush.bf16.msrb.mxu0 %v1386_v6 }
  0x76   : > { %879 = vmatpush.bf16.msrb.mxu0 %v1385_v7 }
  0xd3   : > { %v539_v9 = vpop.xlane.xlu0 %538 }
  0xd4   : > { %v547_v10 = vmul.f32 %v2017_v8, %v539_v9 }
  0xd6   : > { %v548_v11 = vsub.f32 %v2013_v0, %v547_v10  ;;  %v649_v10 = vld [vmem:[#allocation11] sm:$0xff] }
  0xd8   : > { %v549_v12 = vmul.f32 %v548_v11, %v548_v11 }
  0xda   : > { %v550_v13 = vsel %vm536_vm0, %v549_v12, 0.0 }
  0xdb   : > { %551 = vadd.xlane.f32.xlu0 %v550_v13 }
 0x14e   : > { %v552_v38 = vpop.xlane.xlu0 %551 }
 0x14f   : > { %v553_v39 = vmul.f32 %v552_v38, %v2017_v8  ;;  %v535_v38 = vld [vmem:[%s466_s25] sm:$0xff]  ;;  %s1106_s25 = scalar_lea.hbm %s2211_s12, %s1372_s20 }
 0x150   : > { %s1110_s3 = sshll.u32 %s1106_s25, 4  ;;  %s1111_s3 = int_to_ptr.hbm [resolvable:$true] %s1110_s3 }
 0x151   : > { %v554_v40 = vadd.f32 1e-05, %v553_v39  ;;  %s1697_s30 = sshra.s32 %s1111_s3, 4  ;;  %s1698_s30 = int_to_ptr.hbm [resolvable:$true] %s1697_s30 }
 0x152   : > { %s1699_s26 = scalar_lea.hbm %s1698_s30, 8  ;;  %p1704_p7 = scmp.lt.s32.totalorder %s1698_s30, %s2211_s12 }
 0x153   : > { %1504 = vrsqrt.f32 %v554_v40  ;;  %vm561_vm3 = vweird.f32 %v554_v40  ;;  %p1700_p1 = scmp.ne.s32.totalorder %s1698_s30, %s1699_s26  ;;  %p1705_p9 = scmp.lt.s32.totalorder %s1703_s19, %s1699_s26 }
 0x155   : > { %p1701_p3 = pnand %p1700_p1, %p1931_p5  ;;  %p1706_p8 = por %p1705_p9, %p1704_p7 }
 0x157   : > { %p1702_p12 = pneg %p1701_p3 }
 0x159   : > { %v1505_v41 = vpop.eup %1504  ;;  %p1707_p10 = pnand %p1706_p8, %p1702_p12 }
 0x15a   : > { %v556_v42 = vmul.f32 %v1505_v41, %v554_v40  ;;  %vm562_vm2 = vweird.f32 %v1505_v41 }
 0x15b   : > { %vm563_vm4 = vmor %vm561_vm3, %vm562_vm2 }
 0x15c   : > { %v557_v43 = vmul.f32 %v1505_v41, %v556_v42 }
 0x15e   : > { %v558_v44 = vmul.f32 0.5, %v557_v43 }
 0x160   : > { %v559_v45 = vsub.f32 1.5, %v558_v44 }
 0x162   : > { %v560_v46 = vmul.f32 %v1505_v41, %v559_v45 }
 0x164   : > { %v564_v47 = vsel %vm563_vm4, %v1505_v41, %v560_v46 }
 0x165   : > { %v565_v49 = vmul.f32 %v564_v47, %v548_v11 }
 0x167   : > { %v567_v51 = vmul.f32 %v566_v48, %v565_v49 }
 0x169   : > { %v569_v52 = vadd.f32 %v568_v50, %v567_v51 }
 0x16b   : > { %v570_v53 = vpack.c.bf16 %v569_v52, %v569_v52 }
 0x16d   : > { %1298 = vmatmul.msk.bf16.vlgmr.msra.gmra.mxu0 %vm536_vm0, %v570_v53  ;;  %1299 = vmatmul.msk.bf16.vlgmr.msra.gmra.mxu1 %vm536_vm0, %v570_v53 }
 0x1ea   : > { %v631_v54 = vpop.f32.mrf.mxu0  ;;  %v644_v55 = vpop.f32.mrf.mxu1 }
 0x1eb   : > { %674 = vrot.lane.b32.xlu1 %v631_v54, %s1774_s17  ;;  %v669_v25 = vmul.f32 %v648_v1, %v631_v54  ;;  %v703_v31 = vpack.c.bf16 %v644_v55, %v644_v55 }
 0x1ed   : > { %v747_v36 = vsel %vm745_vm8, %v703_v31, 0 }
 0x1f2   : > { %v633_v56 = vpop.f32.mrf.mxu0  ;;  %v646_v57 = vpop.f32.mrf.mxu1 }
 0x1f3   : > { %v804_v57 = vunpack.c.l.b16 %v703_v31  ;;  %v1389_v31 = vld [vmem:[#allocation13 + $0x10] sm:$0xff] }
 0x25d   : > { %v675_v58 = vpop.permute.xlu1 %674 }
 0x25e   : > { %677 = vrot.lane.b32.xlu1 %v675_v58, %s1774_s17 }
 0x2d0   : > { %v678_v59 = vpop.permute.xlu1 %677 }
 0x2d1   : > { %v679_v60 = vsel %vm654_vm5, %v678_v59, %v675_v58 }
 0x2d2   : > { %680 = vrot.lane.b32.xlu2 %v679_v60, %s1774_s17 }
 0x2da   : > { %655 = vrot.lane.b32.xlu2 %v631_v54, %s1774_s17 }
 0x32c   : > { %v681_v61 = vpop.permute.xlu2 %680 }
 0x32d   : > { %v682_v62 = vsel %vm654_vm5, %v681_v61, %v675_v58  ;;  %v805_v58 = vpack.c.b16 %v804_v57, %v804_v57 }
 0x32e   : > { %687 = vrot.lane.b32.xlu1 %v682_v62, %s1775_s27  ;;  %684 = vrot.lane.b32.xlu0 %v682_v62, %s1776_s16 }
 0x334   : > { %v656_v63 = vpop.permute.xlu2 %655 }
 0x335   : > { %v657_v2 = vsel %vm654_vm5, %v656_v63, %v631_v54 }
 0x336   : > { %692 = vrot.lane.b32.xlu1 %v648_v1, %s1774_s17  ;;  %658 = vrot.lane.b32.xlu2 %v657_v2, %s1774_s17 }
 0x390   : > { %v659_v3 = vpop.permute.xlu2 %658 }
 0x391   : > { %v660_v4 = vsel %vm654_vm5, %v659_v3, %v631_v54 }
 0x392   : > { %662 = vrot.lane.b32.xlu1 %v660_v4, %s1776_s16 }
 0x3a0   : > { %v688_v11 = vpop.permute.xlu1 %687  ;;  %v685_v12 = vpop.permute.xlu0 %684 }
 0x3a1   : > { %v690_v13 = vsel %vm2083_vm6, %v685_v12, %v688_v11 }
 0x3a2   : > { %v696_v14 = vmul.f32 %v690_v13, %v649_v10 }
 0x3a4   : > { %698 = vrot.lane.b32.xlu2 %v696_v14, %s1774_s17 }
 0x3a8   : > { %v693_v15 = vpop.permute.xlu1 %692 }
 0x3a9   : > { %v695_v16 = vmul.f32 %v693_v15, %v631_v54  ;;  %v1384_v15 = vld [vmem:[%s2205_s6 + $0x8] sm:$0xff] }
 0x3aa   : > { %880 = vmatpush.bf16.msrb.mxu0 %v1384_v15 }
 0x3ac   : > { %665 = vrot.lane.b32.xlu2 %v660_v4, %s1775_s27 }
 0x3fe   : > { %v699_v17 = vpop.permute.xlu2 %698 }
 0x3ff   : > { %v701_v18 = vadd.f32 %v699_v17, %v695_v16  ;;  %v1383_v16 = vld [vmem:[%s2205_s6] sm:$0xff] }
 0x400   : > { %881 = vmatpush.bf16.msrb.mxu0 %v1383_v16 }
 0x401   : > { %v702_v19 = vpack.c.bf16 %v701_v18, %v701_v18 }
 0x403   : > { %v705_v20 = vunpack.c.l.b16 %v702_v19  ;;  %v1499_v19 = vld [vmem:[%s2206_s7] ss:$0 sm:$0xff] }
 0x404   : > { %v663_v22 = vpop.permute.xlu1 %662 }
 0x405   : > { %v706_v21 = vpack.c.b16 %v705_v20, %v705_v20 }
 0x406   : > { %v666_v23 = vpop.permute.xlu2 %665 }
 0x407   : > { %v668_v24 = vsel %vm2083_vm6, %v663_v22, %v666_v23  ;;  %770 = vrot.lane.b32.xlu1 %v706_v21, %s1777_s14  ;;  %707 = vrot.lane.b32.xlu0 %v706_v21, %s1774_s17 }
 0x408   : > { %v670_v26 = vmul.f32 %v668_v24, %v649_v10 }
 0x40a   : > { %v671_v27 = vadd.f32 %v670_v26, %v669_v25 }
 0x40c   : > { %v672_v28 = vpack.c.bf16 %v671_v27, %v671_v27 }
 0x40e   : > { %v766_v29 = vunpack.c.l.b16 %v672_v28 }
 0x410   : > { %v767_v30 = vpack.c.b16 %v766_v29, %v766_v29 }
 0x412   : > { %768 = vrot.lane.b32.xlu2 %v767_v30, %s1778_s15  ;;  %v1390_v30 = vld [vmem:[#allocation13 + $0x18] sm:$0xff] }
 0x413   : > { %958 = vmatpush.bf16.msrb.mxu1 %v1390_v30 }
 0x417   : > { %959 = vmatpush.bf16.msrb.mxu1 %v1389_v31 }
 0x46c   : > { %v769_v37 = vpop.permute.xlu2 %768 }
 0x479   : > { %v771_v32 = vpop.permute.xlu1 %770  ;;  %v708_v33 = vpop.permute.xlu0 %707 }
 0x47a   : > { %v714_v34 = vsel %vm709_vm7, %v708_v33, 0  ;;  %v776_v35 = vsel %vm709_vm7, %v771_v32, 0  ;;  %v1387_v32 = vld [vmem:[#allocation13] sm:$0xff] }
 0x47b   : > { %723 = vmatpush.bf16.xpose.msra.mxu2 %v714_v34  ;;  %785 = vmatpush.bf16.xpose.msra.mxu3 %v776_v35 }
 0x482   : > { %1300 = vmatmul.msk.bf16.vlgmr.msra.gmra.mxu2 %vm709_vm7, %v672_v28  ;;  %1302 = vmatmul.msk.bf16.vlgmr.msra.gmra.mxu3 %vm709_vm7, %v769_v37 }
 0x483   : > { %756 = vmatpush.bf16.msrb.mxu2 %v747_v36 }
 0x505   : > { %v725_v39 = vpop.f32.mrf.mxu2  ;;  %v787_v40 = vpop.f32.mrf.mxu3 }
 0x506   : > { %v726_v41 = vadd.f32 %v725_v39, %v535_v38  ;;  %v788_v42 = vadd.f32 %v787_v40, %v535_v38 }
 0x508   : > { %v791_v43 = vsel %vm729_vm9, %v788_v42, -inf  ;;  %v730_v44 = vsel %vm729_vm9, %v726_v41, -inf }
 0x509   : > { %792 = vmax.xlane.f32.xlu1 %v791_v43  ;;  %731 = vmax.xlane.f32.xlu0 %v730_v44  ;;  %v910_v43 = vstv %s1264_s24 }
 0x50d   : > { %v727_v45 = vpop.f32.mrf.mxu2  ;;  %v789_v46 = vpop.f32.mrf.mxu3 }
 0x50e   : > { %v912_v45 = vstv %s1265_s29 }
 0x57c   : > { %v793_v47 = vpop.xlane.xlu1 %792  ;;  %v732_v48 = vpop.xlane.xlu0 %731 }
 0x57d   : > { %v794_v49 = vsub.f32 %v788_v42, %v793_v47  ;;  %v733_v50 = vsub.f32 %v726_v41, %v732_v48  ;;  %v1398_v48 = vld [vmem:[%s2209_s10 + $0x38] sm:$0xff] }
 0x57e   : > { %1080 = vmatpush.bf16.msrb.mxu3 %v1398_v48 }
 0x57f   : > { %v795_v51 = vmul.f32 1.442695, %v794_v49  ;;  %v734_v52 = vmul.f32 1.442695, %v733_v50  ;;  %v1397_v49 = vld [vmem:[%s2209_s10 + $0x30] sm:$0xff] }
 0x580   : > { %v1500_v50 = vld [vmem:[%s2208_s9] ss:$0 sm:$0xff] }
 0x581   : > { %1506 = vpow2.f32 %v795_v51 }
 0x582   : > { %1508 = vpow2.f32 %v734_v52  ;;  %1081 = vmatpush.bf16.msrb.mxu3 %v1397_v49  ;;  %v1396_v52 = vld [vmem:[%s2209_s10 + $0x28] sm:$0xff] }
 0x586   : > { %1082 = vmatpush.bf16.msrb.mxu3 %v1396_v52 }
 0x587   : > { %v1507_v53 = vpop.eup %1506 }
 0x588   : > { %v1509_v54 = vpop.eup %1508  ;;  %v797_v55 = vsel %vm729_vm9, %v1507_v53, 0.0 }
 0x589   : > { %798 = vadd.xlane.f32.xlu0 %v797_v55  ;;  %v736_v56 = vsel %vm729_vm9, %v1509_v54, 0.0  ;;  %v1395_v55 = vld [vmem:[%s2209_s10 + $0x20] sm:$0xff] }
 0x58a   : > { %737 = vadd.xlane.f32.xlu2 %v736_v56  ;;  %1083 = vmatpush.bf16.msrb.mxu3 %v1395_v55 }
 0x5a2   : > { %806 = vrot.lane.b32.xlu2 %v805_v58, %s1778_s15 }
 0x5fc   : > { %v799_v1 = vpop.xlane.xlu0 %798 }
 0x5fd   : > { %v738_v59 = vpop.xlane.xlu2 %737 }
 0x5fe   : > { %1510 = vrcp.f32 %v738_v59  ;;  %v1394_v59 = vld [vmem:[%s2209_s10 + $0x18] sm:$0xff] }
 0x5ff   : > { %1512 = vrcp.f32 %v799_v1  ;;  %1084 = vmatpush.bf16.msrb.mxu3 %v1394_v59  ;;  %v1393_v1 = vld [vmem:[%s2209_s10 + $0x10] sm:$0xff] }
 0x603   : > { %1085 = vmatpush.bf16.msrb.mxu3 %v1393_v1 }
 0x604   : > { %v1511_v60 = vpop.eup %1510 }
 0x605   : > { %v740_v61 = vmul.f32 %v1511_v60, %v1509_v54  ;;  %v807_v62 = vpop.permute.xlu2 %806  ;;  %v1513_v3 = vpop.eup %1512 }
 0x606   : > { %v812_v63 = vsel %vm745_vm8, %v807_v62, 0  ;;  %v801_v4 = vmul.f32 %v1513_v3, %v1507_v53 }
 0x607   : > { %821 = vmatpush.bf16.msra.mxu2 %v812_v63  ;;  %v741_v2 = vpack.c.bf16 %v740_v61, %v740_v61 }
 0x608   : > { %v802_v5 = vpack.c.bf16 %v801_v4, %v801_v4  ;;  %v1392_v4 = vld [vmem:[%s2209_s10 + $0x8] sm:$0xff] }
 0x609   : > { %1301 = vmatmul.msk.bf16.vlgmr.msrb.gmra.mxu2 %vm729_vm9, %v741_v2  ;;  %1086 = vmatpush.bf16.msrb.mxu3 %v1392_v4 }
 0x619   : > { %1303 = vmatmul.msk.bf16.vlgmr.msra.gmra.mxu2 %vm729_vm9, %v802_v5 }
 0x68c   : > { %v758_v9 = vpop.f32.mrf.mxu2 }
 0x68d   : > { %v762_v10 = vpack.c.bf16 %v758_v9, %v758_v9  ;;  %v1391_v9 = vld [vmem:[%s2209_s10] sm:$0xff] }
 0x68e   : > { %1087 = vmatpush.bf16.msrb.mxu3 %v1391_v9 }
 0x68f   : > { %764 = vst.msk [vmem:[#allocation2] sm:$0xf] %vm763_vm10, %v762_v10 }
 0x694   : > { %v760_v11 = vpop.f32.mrf.mxu2 }
 0x69c   : > { %v823_v12 = vpop.f32.mrf.mxu2 }
 0x69d   : > { %v827_v13 = vpack.c.bf16 %v823_v12, %v823_v12 }
 0x69f   : > { %829 = vrot.lane.b32.xlu1 %v827_v13, %s1777_s14 }
 0x6a4   : > { %v825_v14 = vpop.f32.mrf.mxu2 }
 0x711   : > { %v830_v17 = vpop.permute.xlu1 %829 }
 0x712   : > { %833 = vst.msk [vmem:[#allocation2] sm:$0xf] %vm832_vm11, %v830_v17 }
 0x719   : > { %v834_v18 = vld [vmem:[#allocation2] sm:$0xf] }
 0x71a   : > { %1320 = vmatmul.msk.bf16.vlgmr.msrb.gmra.mxu0 %vm536_vm0, %v834_v18 }
 0x797   : > { %v883_v20 = vpop.f32.mrf.mxu0 }
 0x798   : > { %v884_v21 = vadd.f32 %v1499_v19, %v883_v20 }
 0x79a   : > { %v2124_v22 = vadd.f32 %v884_v21, %v2013_v0  ;;  %v1388_v0 = vld [vmem:[#allocation13 + $0x8] sm:$0xff] }
 0x79b   : > { %960 = vmatpush.bf16.msrb.mxu1 %v1388_v0 }
 0x79c   : > { %v888_v23 = vsel %vm536_vm0, %v2124_v22, 0.0 }
 0x79d   : > { %889 = vadd.xlane.f32.xlu0 %v888_v23 }
 0x79f   : > { %v885_v24 = vpop.f32.mrf.mxu0  ;;  %961 = vmatpush.bf16.msrb.mxu1 %v1387_v32 }
 0x810   : > { %v890_v25 = vpop.xlane.xlu0 %889 }
 0x811   : > { %v891_v26 = vmul.f32 %v890_v25, %v2017_v8 }
 0x813   : > { %v892_v27 = vsub.f32 %v2124_v22, %v891_v26 }
 0x815   : > { %v893_v28 = vmul.f32 %v892_v27, %v892_v27 }
 0x817   : > { %v894_v29 = vsel %vm536_vm0, %v893_v28, 0.0 }
 0x818   : > { %895 = vadd.xlane.f32.xlu0 %v894_v29 }
 0x88b   : > { %v896_v33 = vpop.xlane.xlu0 %895 }
 0x88c   : > { %v897_v34 = vmul.f32 %v896_v33, %v2017_v8 }
 0x88e   : > { %v898_v35 = vadd.f32 1e-05, %v897_v34 }
 0x890   : > { %1514 = vrsqrt.f32 %v898_v35  ;;  %vm905_vm13 = vweird.f32 %v898_v35 }
 0x896   : > { %v1515_v36 = vpop.eup %1514 }
 0x897   : > { %v900_v37 = vmul.f32 %v1515_v36, %v898_v35  ;;  %vm906_vm12 = vweird.f32 %v1515_v36 }
 0x898   : > { %vm907_vm14 = vmor %vm905_vm13, %vm906_vm12 }
 0x899   : > { %v901_v38 = vmul.f32 %v1515_v36, %v900_v37 }
 0x89b   : > { %v902_v39 = vmul.f32 0.5, %v901_v38  ;;  %v1501_v38 = vld [vmem:[%s2210_s11] ss:$0 sm:$0xff] }
 0x89d   : > { %v903_v40 = vsub.f32 1.5, %v902_v39 }
 0x89f   : > { %v904_v41 = vmul.f32 %v1515_v36, %v903_v40 }
 0x8a1   : > { %v908_v42 = vsel %vm907_vm14, %v1515_v36, %v904_v41 }
 0x8a2   : > { %v909_v44 = vmul.f32 %v908_v42, %v892_v27 }
 0x8a4   : > { %v911_v46 = vmul.f32 %v910_v43, %v909_v44 }
 0x8a6   : > { %v913_v47 = vadd.f32 %v912_v45, %v911_v46 }
 0x8a8   : > { %v914_v8 = vpack.c.bf16 %v913_v47, %v913_v47 }
 0x8aa   : > { %1337 = vmatmul.msk.bf16.vlgmr.msrb.gmra.mxu1 %vm536_vm0, %v914_v8 }
 0x927   : > { %v963_v51 = vpop.f32.mrf.mxu1 }
 0x928   : > { %v964_v53 = vadd.f32 %v1500_v50, %v963_v51 }
 0x92a   : > { %v968_v54 = vmul.f32 0.70710677, %v964_v53  ;;  %v967_v34 = vmul.f32 0.5, %v964_v53 }
 0x92c   : > { %v969_v56 = vmul.f32 %v968_v54, %v968_v54 }
 0x92e   : > { %v970_v57 = vmin.f32 %v969_v56, 16.0 }
 0x92f   : > { %v965_v58 = vpop.f32.mrf.mxu1 }
 0x930   : > { %v971_v60 = vmul.f32 2.1237322e-06, %v970_v57  ;;  %v982_v61 = vmul.f32 3.8918573e-05, %v970_v57 }
 0x932   : > { %v972_v62 = vadd.f32 0.00028619796, %v971_v60  ;;  %v983_v63 = vadd.f32 0.001143296, %v982_v61 }
 0x934   : > { %v973_v2 = vmul.f32 %v972_v62, %v970_v57  ;;  %v984_v3 = vmul.f32 %v983_v63, %v970_v57 }
 0x936   : > { %v985_v5 = vadd.f32 0.014752088, %v984_v3  ;;  %v974_v6 = vadd.f32 0.0036580483, %v973_v2 }
 0x938   : > { %v986_v7 = vmul.f32 %v985_v5, %v970_v57  ;;  %v975_v11 = vmul.f32 %v974_v6, %v970_v57 }
 0x93a   : > { %v987_v10 = vadd.f32 0.112945676, %v986_v7  ;;  %v976_v14 = vadd.f32 0.05243302, %v975_v11 }
 0x93c   : > { %v988_v12 = vmul.f32 %v987_v10, %v970_v57  ;;  %v977_v17 = vmul.f32 %v976_v14, %v970_v57 }
 0x93e   : > { %v989_v13 = vadd.f32 0.4994258, %v988_v12  ;;  %v978_v18 = vadd.f32 0.18741608, %v977_v17 }
 0x940   : > { %v990_v15 = vmul.f32 %v989_v13, %v970_v57  ;;  %v979_v20 = vmul.f32 %v978_v18, %v970_v57 }
 0x942   : > { %v991_v16 = vadd.f32 1.0, %v990_v15  ;;  %v980_v25 = vadd.f32 1.1283791, %v979_v20 }
 0x944   : > { %1516 = vrcp.f32 %v991_v16  ;;  %v1003_v24 = vand.u32 2147483648, %v991_v16  ;;  %v1001_v27 = vand.u32 2147483647, %v991_v16  ;;  %vm997_vm1 = vweird.f32 %v991_v16 }
 0x945   : > { %v981_v30 = vmul.f32 %v980_v25, %v968_v54 }
 0x946   : > { %v1004_v29 = vor.u32 1.1754944e-38, %v1003_v24  ;;  %vm1002_vm3 = vcmp.eq.f32.partialorder %v1001_v27, 8.507059e+37 }
 0x94a   : > { %v1517_v19 = vpop.eup %1516 }
 0x94b   : > { %v993_v21 = vmul.f32 %v1517_v19, %v991_v16  ;;  %vm998_vm15 = vweird.f32 %v1517_v19 }
 0x94c   : > { %vm999_vm2 = vmor %vm997_vm1, %vm998_vm15 }
 0x94d   : > { %v994_v23 = vsub.f32 1.0, %v993_v21 }
 0x94f   : > { %v995_v26 = vmul.f32 %v1517_v19, %v994_v23 }
 0x951   : > { %v996_v28 = vadd.f32 %v1517_v19, %v995_v26 }
 0x953   : > { %v1000_v31 = vsel %vm999_vm2, %v1517_v19, %v996_v28 }
 0x954   : > { %v1005_v0 = vsel %vm1002_vm3, %v1004_v29, %v1000_v31 }
 0x955   : > { %v1006_v32 = vmul.f32 %v1005_v0, %v981_v30 }
 0x957   : > { %v1338_v33 = vclamps-f32 %v1006_v32, 1.0 }
 0x959   : > { %v1009_v35 = vadd.f32 1.0, %v1338_v33 }
 0x95b   : > { %v1010_v36 = vmul.f32 %v1009_v35, %v967_v34 }
 0x95d   : > { %v1011_v37 = vpack.c.bf16 %v1010_v36, %v1010_v36 }
 0x95f   : > { %1088 = vmatmul.bf16.vlgmr.msrb.gmra.mxu3 %v1011_v37 }
 0x9e2   : > { %v1089_v39 = vpop.f32.mrf.mxu3 }
 0x9e3   : > { %v1090_v40 = vadd.f32 %v1501_v38, %v1089_v39 }
 0x9e5   : > { %v1093_v41 = vadd.f32 %v1090_v40, %v2124_v22 }
 0x9e7   : > { %1094 = vst.msk [vmem:[%s528_s13] sm:$0xff] %vm536_vm0, %v1093_v41 }
 0x9e8   : > { %1710 = shalt.err (!%p1707_p10)
}
 0x9e9   : > { %1419 = dma.vmem_to_hbm [thread:$0]  (%p1931_p5), %s1109_s0, 128, %s1111_s3, %s1096_s28  }
 0x9ea   : > { %v1091_v22 = vpop.f32.mrf.mxu3 }
 0x9eb PF: > { %s2245_s21 = sld [smem:[#allocation21_spill]] }
 0x9ec   : > { %s2247_s29 = sld [smem:[#allocation23_spill]] }
 0x9f1   : > { %s1122_s20 = sand.u32 1, %s2245_s21  }
 0x9f2   : > { %p2248_p11 = scmp.ge.s32.totalorder %s2247_s29, 2  ;;  %s1123_s17 = scalar_lea.sflag [#allocation5], %s1122_s20 }
 0x9f4   : > { %p1442_p4 = pnand %p2248_p11, %p1935_p6 }
 0x9f6   : > { %p1443_p13 = pneg %p1442_p4 }
 0x9f8   : > { %1748 = dma.done.wait (%p1443_p13), %s1123_s17, 128  }
 0x9f9   : > { %1750 = vsyncadd (%p1443_p13), %s1123_s17, 4294967168  ;;  %s2249_s24 = sld [smem:[#allocation24_spill]]  ;;  %s2252_s21 = smov %s1757_s22 }
 0x9fa   : > { %s2250_s27 = sld [smem:[#allocation22_spill]] }
 0x9fb   : > { %s2251_s23 = sld [smem:[#allocation25_spill]] }
 0x9ff   : > { %p30_p0 = scmp.ge.s32.totalorder %s2249_s24, 4  }
 0xa00   : > { %s2253_s22 = smov %s2250_s27 }
 0xa01   :  { %32 = sbr.rel (!%p30_p0) target bundleno = 14 (0xe), region = 143 }
 0xa06   :  { %1129 = vsyncpa [#allocation4], 1 }
 0xa07   :  { %1131 = vsyncpa [#allocation4 + $0x1], 1 }
 0xa08   :  { %1132 = vsyncpa [#allocation9], 1 }
 0xa09   :  { %1134 = vsyncpa [#allocation9 + $0x1], 1 }
 0xa0a   :  { %1135 = vsyncpa [#allocation12], 1 }
 0xa0b   :  { %1136 = vsyncpa [#allocation5], 1 }
 0xa0c   :  { %1138 = vsyncpa [#allocation5 + $0x1], 1 }
 0xa0d   :  { %1139 = vsyncpa [#allocation6], 1 }
 0xa0e   :  { %1141 = vsyncpa [#allocation6 + $0x1], 1 }

</bundles_post_ra>
